<compile_context>
chip_gen: v6e
topology: v6e:2x2x1
jax: 0.10.0
libtpu: 0.0.40
codegen_flags: <defaults>
</compile_context>

<pallas_src>
import functools

import jax
import jax.numpy as jnp
from jax.experimental import pallas as pl
from jax.experimental.pallas import tpu as pltpu


def _round_up(x, m):
    return ((x + m - 1) // m) * m


def _pick_tile_n(n, c, itemsize):
    """Rows per grid step: large enough to pipeline well, small enough that the
    two double-buffered (tile_n, C) logits tiles fit comfortably inside the
    default scoped VMEM on every generation (16 MiB v5e, 32 MiB v6e/v7x)."""
    budget_bytes = 6 * 1024 * 1024                       # per logits buffer
    rows_by_vmem = max(16, (budget_bytes // max(1, c * itemsize)) // 16 * 16)
    return max(16, min(1024, rows_by_vmem, _round_up(n, 16)))


def _per_row_focal(x_raw, t, alpha, gamma):
    """Focal loss per row for a (tile_n, C) logits tile and (tile_n, 1) int32
    targets. Returns (tile_n, 1) float32. Does NOT materialize log-softmax."""
    x = x_raw.astype(jnp.float32)                                    # (T, C)
    m = jnp.max(x, axis=-1, keepdims=True)                           # (T, 1)
    lse = jnp.log(jnp.sum(jnp.exp(x - m), axis=-1, keepdims=True))   # (T, 1)
    cls = jax.lax.broadcasted_iota(jnp.int32, x.shape, 1)            # (T, C)
    x_t = jnp.sum(jnp.where(cls == t, x, 0.0), axis=-1, keepdims=True)
    ce = jnp.maximum((m + lse) - x_t, 0.0)       # clamp => pt <= 1, no NaN pow
    pt = jnp.exp(-ce)                                                # EUP
    w = 1.0 - pt
    g = float(gamma)
    if g == int(g) and 0 <= int(g) <= 8:         # integer-gamma fast path
        wg = jnp.ones_like(w)
        for _ in range(int(g)):
            wg = wg * w
    else:
        wg = jnp.maximum(w, 0.0) ** g            # float pow: log+exp on EUP
    return alpha * wg * ce


def _focal_sum_kernel(logits_ref, targets_ref, out_ref, *, alpha, gamma,
                      n_valid, tile_n):
    # out_ref is a (1, 1) accumulator: same output block every grid step, so it
    # stays resident in VMEM and is written back to HBM once at the end.
    i = pl.program_id(0)

    @pl.when(i == 0)
    def _init():
        out_ref[...] = jnp.zeros_like(out_ref)

    focal = _per_row_focal(logits_ref[...], targets_ref[...], alpha, gamma)
    # Mask rows of the (possibly partial) last tile before reducing.
    row = i * tile_n + jax.lax.broadcasted_iota(jnp.int32, (tile_n, 1), 0)
    focal = jnp.where(row < n_valid, focal, 0.0)
    out_ref[...] += jnp.sum(focal, axis=0, keepdims=True)


def _focal_none_kernel(logits_ref, targets_ref, out_ref, *, alpha, gamma):
    out_ref[...] = _per_row_focal(logits_ref[...], targets_ref[...],
                                  alpha, gamma)


def focal_loss(logits, targets, alpha=1.0, gamma=2.0, reduction="mean"):
    """Pallas TPU implementation matching torch FocalLoss.forward.

    logits: (N, C) float (f32 or bf16 — left in its HBM dtype, upcast in-kernel).
    targets: (N,) integer class indices.
    """
    n, c = logits.shape
    targets_2d = targets.astype(jnp.int32).reshape(n, 1)
    tile_n = _pick_tile_n(n, c, jnp.dtype(logits.dtype).itemsize)
    num_tiles = pl.cdiv(n, tile_n)

    # TODO(synk): for vocab-scale C that cannot fit a (tile_n, C) block in VMEM,
    # add a second ("arbitrary", last) grid axis over C with an online
    # max/logsumexp accumulator.
    in_specs = [
        pl.BlockSpec((tile_n, c), lambda i: (i, 0)),
        pl.BlockSpec((tile_n, 1), lambda i: (i, 0)),
    ]

    if reduction in ("mean", "sum"):
        # Fused reduction: the batch grid axis carries the accumulator, so it
        # must be "arbitrary" (per-core partials would be needed to also use
        # both v7x TensorCores for this path).
        total = pl.pallas_call(
            functools.partial(_focal_sum_kernel, alpha=float(alpha),
                              gamma=float(gamma), n_valid=n, tile_n=tile_n),
            out_shape=jax.ShapeDtypeStruct((1, 1), jnp.float32),
            grid=(num_tiles,),
            in_specs=in_specs,
            out_specs=pl.BlockSpec((1, 1), lambda i: (0, 0)),
            compiler_params=pltpu.CompilerParams(
                dimension_semantics=("arbitrary",)),
        )(logits, targets_2d)[0, 0]
        return total / n if reduction == "mean" else total

    # reduction == "none": per-sample losses, embarrassingly parallel batch axis.
    per_sample = pl.pallas_call(
        functools.partial(_focal_none_kernel, alpha=float(alpha),
                          gamma=float(gamma)),
        out_shape=jax.ShapeDtypeStruct((n, 1), jnp.float32),
        grid=(num_tiles,),
        in_specs=in_specs,
        out_specs=pl.BlockSpec((tile_n, 1), lambda i: (i, 0)),
        compiler_params=pltpu.CompilerParams(
            dimension_semantics=("parallel",)),
    )(logits, targets_2d)
    return per_sample.reshape(n)


def _focal_loss_ref(logits, targets, alpha=1.0, gamma=2.0, reduction="mean"):
    # Pure-JAX reference for sanity checking.
    logp = jax.nn.log_softmax(logits.astype(jnp.float32), axis=-1)
    ce = -jnp.take_along_axis(logp, targets[:, None].astype(jnp.int32),
                              axis=-1)[:, 0]
    pt = jnp.exp(-ce)
    fl = alpha * (1.0 - pt) ** gamma * ce
    if reduction == "mean":
        return jnp.mean(fl)
    if reduction == "sum":
        return jnp.sum(fl)
    return fl


if __name__ == "__main__":
    key = jax.random.PRNGKey(0)
    k1, k2 = jax.random.split(key)

    # Small deterministic example: 24 samples (not a multiple of the 16-row
    # tile granule -> exercises the partial-tile mask) and 32 classes.
    N, C = 24, 32
    logits = jax.random.normal(k1, (N, C), dtype=jnp.float32)
    targets = jax.random.randint(k2, (N,), 0, C, dtype=jnp.int32)

    for red in ("mean", "sum", "none"):
        out = jax.block_until_ready(
            focal_loss(logits, targets, alpha=1.0, gamma=2.0, reduction=red))
        ref = _focal_loss_ref(logits, targets, 1.0, 2.0, red)
        assert jnp.allclose(out, ref, atol=1e-5, rtol=1e-5), (red, out, ref)

    print("KERNEL_OK")
</pallas_src>

<mosaic_0001>
module attributes {stable_mosaic.version = 11 : i64} {
  func.func @_focal_sum_kernel(%arg0: i32, %arg1: memref<32x32xf32, #tpu.memory_space<vmem>>, %arg2: memref<32x1xi32, #tpu.memory_space<vmem>>, %arg3: memref<1x1xf32, #tpu.memory_space<vmem>>) attributes {dimension_semantics = [#tpu.dimension_semantics<arbitrary>], iteration_bounds = array<i64: 1>, scalar_prefetch = 0 : i64, scratch_operands = 0 : i64, tpu.core_type = #tpu.core_type<tc>, window_params = [{transform_indices = @transform_0, window_bounds = array<i64: 32, 32>}, {transform_indices = @transform_1, window_bounds = array<i64: 32, 1>}, {pipeline_mode = #tpu.pipeline_mode<synchronous>, transform_indices = @transform_2, window_bounds = array<i64: 1, 1>}]} {
    %c0_i32 = arith.constant 0 : i32
    %0 = arith.cmpi eq, %arg0, %c0_i32 : i32
    %1 = arith.extui %0 : i1 to i32
    %c0_i32_0 = arith.constant 0 : i32
    %2 = arith.cmpi ne, %1, %c0_i32_0 : i32
    scf.if %2 {
      %cst_18 = arith.constant 0.000000e+00 : f32
      %48 = vector.broadcast %cst_18 : f32 to vector<1x1xf32>
      %c0_19 = arith.constant 0 : index
      %c0_20 = arith.constant 0 : index
      %49 = vector.load %arg3[%c0_19, %c0_20] : memref<1x1xf32, #tpu.memory_space<vmem>>, vector<1x1xf32>
      tpu.vector_store %arg3[%c0_19, %c0_20], %48 {strides = array<i32>} : memref<1x1xf32, #tpu.memory_space<vmem>>, vector<1x1xf32>,
    } else {
    }
    %c0 = arith.constant 0 : index
    %c0_1 = arith.constant 0 : index
    %3 = vector.load %arg1[%c0, %c0_1] : memref<32x32xf32, #tpu.memory_space<vmem>>, vector<32x32xf32>
    %c0_2 = arith.constant 0 : index
    %c0_3 = arith.constant 0 : index
    %4 = vector.load %arg2[%c0_2, %c0_3] : memref<32x1xi32, #tpu.memory_space<vmem>>, vector<32x1xi32>
    %cst = arith.constant dense<0xFF800000> : vector<32xf32>
    %5 = vector.multi_reduction <maximumf>, %3, %cst [1] : vector<32x32xf32> to vector<32xf32>
    %6 = vector.shape_cast %5 : vector<32xf32> to vector<32x1xf32>
    %7 = vector.broadcast %6 : vector<32x1xf32> to vector<32x32xf32>
    %8 = arith.subf %3, %7 : vector<32x32xf32>
    %9 = math.exp %8 : vector<32x32xf32>
    %cst_4 = arith.constant dense<0.000000e+00> : vector<32xf32>
    %10 = vector.multi_reduction <add>, %9, %cst_4 [1] : vector<32x32xf32> to vector<32xf32>
    %11 = vector.shape_cast %10 : vector<32xf32> to vector<32x1xf32>
    %12 = math.log %11 : vector<32x1xf32>
    %13 = tpu.iota {dimensions = array<i32: 1>} : vector<32x32xi32>
    %14 = vector.broadcast %4 : vector<32x1xi32> to vector<32x32xi32>
    %15 = arith.cmpi eq, %13, %14 : vector<32x32xi32>
    %cst_5 = arith.constant 0.000000e+00 : f32
    %16 = vector.broadcast %cst_5 : f32 to vector<32x32xf32>
    %17 = arith.select %15, %3, %16 : vector<32x32xi1>, vector<32x32xf32>
    %cst_6 = arith.constant dense<0.000000e+00> : vector<32xf32>
    %18 = vector.multi_reduction <add>, %17, %cst_6 [1] : vector<32x32xf32> to vector<32xf32>
    %19 = vector.shape_cast %18 : vector<32xf32> to vector<32x1xf32>
    %20 = arith.addf %6, %12 : vector<32x1xf32>
    %21 = arith.subf %20, %19 : vector<32x1xf32>
    %cst_7 = arith.constant 0.000000e+00 : f32
    %22 = vector.broadcast %cst_7 : f32 to vector<32x1xf32>
    %23 = arith.maximumf %21, %22 : vector<32x1xf32>
    %cst_8 = arith.constant 0.000000e+00 : f32
    %24 = vector.broadcast %cst_8 : f32 to vector<32x1xf32>
    %25 = arith.subf %24, %23 : vector<32x1xf32>
    %26 = math.exp %25 : vector<32x1xf32>
    %cst_9 = arith.constant 1.000000e+00 : f32
    %27 = vector.broadcast %cst_9 : f32 to vector<32x1xf32>
    %28 = arith.subf %27, %26 : vector<32x1xf32>
    %cst_10 = arith.constant 1.000000e+00 : f32
    %29 = vector.broadcast %cst_10 : f32 to vector<32x1xf32>
    %30 = arith.mulf %29, %28 : vector<32x1xf32>
    %31 = arith.mulf %30, %28 : vector<32x1xf32>
    %cst_11 = arith.constant 1.000000e+00 : f32
    %32 = vector.broadcast %cst_11 : f32 to vector<32x1xf32>
    %33 = arith.mulf %32, %31 : vector<32x1xf32>
    %34 = arith.mulf %33, %23 : vector<32x1xf32>
    %c32_i32 = arith.constant 32 : i32
    %35 = arith.muli %arg0, %c32_i32 : i32
    %36 = tpu.iota {dimensions = array<i32: 0>} : vector<32x1xi32>
    %37 = vector.broadcast %35 : i32 to vector<32x1xi32>
    %38 = arith.addi %37, %36 : vector<32x1xi32>
    %c24_i32 = arith.constant 24 : i32
    %39 = vector.broadcast %c24_i32 : i32 to vector<32x1xi32>
    %40 = arith.cmpi slt, %38, %39 : vector<32x1xi32>
    %cst_12 = arith.constant 0.000000e+00 : f32
    %41 = vector.broadcast %cst_12 : f32 to vector<32x1xf32>
    %42 = arith.select %40, %34, %41 : vector<32x1xi1>, vector<32x1xf32>
    %c0_13 = arith.constant 0 : index
    %c0_14 = arith.constant 0 : index
    %43 = vector.load %arg3[%c0_13, %c0_14] : memref<1x1xf32, #tpu.memory_space<vmem>>, vector<1x1xf32>
    %cst_15 = arith.constant dense<0.000000e+00> : vector<1xf32>
    %44 = vector.multi_reduction <add>, %42, %cst_15 [0] : vector<32x1xf32> to vector<1xf32>
    %45 = vector.shape_cast %44 : vector<1xf32> to vector<1x1xf32>
    %46 = arith.addf %43, %45 : vector<1x1xf32>
    %c0_16 = arith.constant 0 : index
    %c0_17 = arith.constant 0 : index
    %47 = vector.load %arg3[%c0_16, %c0_17] : memref<1x1xf32, #tpu.memory_space<vmem>>, vector<1x1xf32>
    tpu.vector_store %arg3[%c0_16, %c0_17], %46 {strides = array<i32>} : memref<1x1xf32, #tpu.memory_space<vmem>>, vector<1x1xf32>,
    return
  }
  func.func @transform_0(%arg0: i32) -> (i32, i32) {
    %c0_i32 = arith.constant 0 : i32
    %c0_i32_0 = arith.constant 0 : i32
    return %arg0, %c0_i32 : i32, i32
  }
  func.func @transform_1(%arg0: i32) -> (i32, i32) {
    %c0_i32 = arith.constant 0 : i32
    %c0_i32_0 = arith.constant 0 : i32
    return %arg0, %c0_i32 : i32, i32
  }
  func.func @transform_2(%arg0: i32) -> (i32, i32) {
    %c0_i32 = arith.constant 0 : i32
    %c0_i32_0 = arith.constant 0 : i32
    %c0_i32_1 = arith.constant 0 : i32
    return %c0_i32, %c0_i32_0 : i32, i32
  }
}

</mosaic_0001>

<bundles_post_ra>
// kernel: tpu_custom_call.1
= control target key start
LH: loop header
LB: loop body
LE: loop exit
PB: predicated region body
PF: predicated region fallthrough
CT: control target
= control target key end

     0   :  { %vm26_vm0 = vcmask 261120   ;;  %v232_v5 = vmov 0   ;;  %s282_s0 = inlined_call_operand.vmem [shape: f32[24,32], index: 0, kind: input, shape index: {}]   ;;  %s283_s1 = inlined_call_operand.vmem [shape: s32[24,1], index: 1, kind: input, shape index: {}]   ;;  %s284_s2 = inlined_call_operand.hbm [shape: f32[1,1], index: 2, kind: output, shape index: {}]  }
   0x1   :  { %v18_v0 = vld [vmem:[%s282_s0] sm:$0xff]  ;;  %v20_v1 = vld [vmem:[%s282_s0 + $0x10] sm:$0xff]  ;;  %v19_v2 = vld [vmem:[%s282_s0 + $0x8] sm:$0xff]  ;;  %190 = vset.pattern.permute.xlu1 %v232_v5  ;;  %191 = vset.pattern.permute.xlu0 %v232_v5 }
   0x2   :  { %v27_v3 = vsel %vm26_vm0, %v18_v0, -inf  ;;  %v33_v4 = vsel %vm26_vm0, %v20_v1, -inf }
   0x3   :  { %28 = vmax.xlane.f32.xlu0 %v27_v3  ;;  %34 = vmax.xlane.f32.xlu1 %v33_v4 }
   0x4   :  { %7 = vsyncpa [#allocation3], 0  ;;  %v30_v6 = vsel %vm26_vm0, %v19_v2, -inf  ;;  %v22_v7 = vld [vmem:[%s283_s1] sm:$0xff]  ;;  %v24_v8 = vld [vmem:[%s283_s1 + $0x10] sm:$0xff]  ;;  %v71_v19 = vlaneseq  ;;  %vm16_vm4 = vcmask 0  }
   0x5   :  { %v23_v9 = vld [vmem:[%s283_s1 + $0x8] sm:$0xff]  ;;  %v233_v36 = vmov 0.0   ;;  %s234_s1 = smov [#allocation2]  }
   0x6   :  { %v72_v20 = vand.u32 127, %v71_v19  ;;  %17 = vst.msk [vmem:[#allocation2] sm:$0x1] %vm16_vm4, %v233_v36  ;;  %s179_s20 = sshll.u32 %s234_s1, 4  ;;  %s180_s20 = int_to_ptr.vmem [resolvable:$true] %s179_s20 }
   0x7   :  { %31 = vmax.xlane.f32.xlu0 %v30_v6  ;;  %s210_s21 = scalar_lea.vmem %s180_s20, 16  ;;  %s214_s22 = scalar_lea.vmem %s180_s20, 32 }
   0x8   :  { %p211_p0 = scmp.ne.s32.totalorder %s180_s20, %s210_s21  ;;  %p215_p1 = scmp.lt.s32.totalorder %s180_s20, %s180_s20 }
   0x9   :  { %p216_p2 = scmp.lt.s32.totalorder %s214_s22, %s210_s21 }
   0xb   :  { %p217_p3 = por %p216_p2, %p215_p1 }
   0xd   :  { %v160_v19 = vld [vmem:[#allocation2] sm:$0x1]  ;;  %p218_p4 = pnand %p217_p3, %p211_p0 }
  0x14   :  { %74 = vperm.xlu1 %190, %v22_v7  }
  0x18   :  { %80 = vperm.xlu1 %190, %v24_v8  }
  0x1d   :  { %77 = vperm.xlu0 %191, %v23_v9  }
  0x8c   :  { %v29_v10 = vpop.xlane.xlu0 %28  ;;  %v35_v11 = vpop.xlane.xlu1 %34 }
  0x8d   :  { %v39_v12 = vsub.f32 %v18_v0, %v29_v10  ;;  %v41_v13 = vsub.f32 %v20_v1, %v35_v11 }
  0x8f   :  { %v43_v14 = vmul.f32 1.442695, %v39_v12  ;;  %v47_v15 = vmul.f32 1.442695, %v41_v13 }
  0x90   :  { %v32_v16 = vpop.xlane.xlu0 %31  ;;  %v75_v21 = vpop.permute.xlu1 %74 }
  0x91   :  { %192 = vpow2.f32 %v43_v14  ;;  %v40_v17 = vsub.f32 %v19_v2, %v32_v16  ;;  %vm85_vm1 = vcmp.eq.s32.totalorder %v72_v20, %v75_v21 }
  0x92   :  { %194 = vpow2.f32 %v47_v15  ;;  %v89_v28 = vsel %vm85_vm1, %v18_v0, 0.0 }
  0x93   :  { %v45_v18 = vmul.f32 1.442695, %v40_v17  ;;  %v93_v31 = vsel %vm26_vm0, %v89_v28, 0.0 }
  0x94   :  { %v81_v30 = vpop.permute.xlu1 %80 }
  0x95   :  { %196 = vpow2.f32 %v45_v18  ;;  %vm87_vm3 = vcmp.eq.s32.totalorder %v72_v20, %v81_v30 }
  0x96   :  { %v91_v34 = vsel %vm87_vm3, %v20_v1, 0.0 }
  0x97   :  { %v99_v35 = vsel %vm26_vm0, %v91_v34, 0.0 }
  0x98   :  { %v78_v25 = vpop.permute.xlu0 %77 }
  0x99   :  { %vm86_vm2 = vcmp.eq.s32.totalorder %v72_v20, %v78_v25 }
  0x9a   :  { %v90_v32 = vsel %vm86_vm2, %v19_v2, 0.0 }
  0x9b   :  { %v96_v33 = vsel %vm26_vm0, %v90_v32, 0.0 }
  0x9e   :  { %v193_v22 = vpop.eup %192 }
  0x9f   :  { %v195_v23 = vpop.eup %194  ;;  %v51_v24 = vsel %vm26_vm0, %v193_v22, 0.0 }
  0xa0   :  { %52 = vadd.xlane.f32.xlu1 %v51_v24  ;;  %v57_v26 = vsel %vm26_vm0, %v195_v23, 0.0 }
  0xa2   :  { %v197_v27 = vpop.eup %196 }
  0xa3   :  { %v54_v29 = vsel %vm26_vm0, %v197_v27, 0.0 }
  0xa4   :  { %58 = vadd.xlane.f32.xlu1 %v57_v26  ;;  %55 = vadd.xlane.f32.xlu0 %v54_v29 }
  0xa8   :  { %94 = vadd.xlane.f32.xlu1 %v93_v31 }
  0xac   :  { %97 = vadd.xlane.f32.xlu1 %v96_v33 }
  0xb0   :  { %100 = vadd.xlane.f32.xlu1 %v99_v35 }
 0x129   :  { %v53_v37 = vpop.xlane.xlu1 %52 }
 0x12a   :  { %198 = vlog2.f32 %v53_v37 }
 0x12d   :  { %v59_v38 = vpop.xlane.xlu1 %58  ;;  %v56_v39 = vpop.xlane.xlu0 %55 }
 0x12e   :  { %200 = vlog2.f32 %v59_v38 }
 0x12f   :  { %202 = vlog2.f32 %v56_v39 }
 0x131   :  { %v95_v40 = vpop.xlane.xlu1 %94 }
 0x135   :  { %v98_v43 = vpop.xlane.xlu1 %97 }
 0x137   :  { %v199_v41 = vpop.eup %198 }
 0x138   :  { %v64_v42 = vmul.f32 0.6931472, %v199_v41 }
 0x139   :  { %v101_v53 = vpop.xlane.xlu1 %100 }
 0x13a   :  { %v105_v44 = vadd.f32 %v64_v42, %v29_v10 }
 0x13b   :  { %v201_v45 = vpop.eup %200 }
 0x13c   :  { %v203_v46 = vpop.eup %202  ;;  %v68_v47 = vmul.f32 0.6931472, %v201_v45  ;;  %v109_v48 = vsub.f32 %v105_v44, %v95_v40 }
 0x13d   :  { %v66_v49 = vmul.f32 0.6931472, %v203_v46 }
 0x13e   :  { %v113_v50 = vmax.f32 %v109_v48, 0.0  ;;  %v107_v51 = vadd.f32 %v68_v47, %v35_v11 }
 0x13f   :  { %v106_v52 = vadd.f32 %v66_v49, %v32_v16 }
 0x140   :  { %v117_v54 = vsub.f32 0.0, %v113_v50  ;;  %v111_v55 = vsub.f32 %v107_v51, %v101_v53 }
 0x141   :  { %v110_v56 = vsub.f32 %v106_v52, %v98_v43 }
 0x142   :  { %v121_v57 = vmul.f32 1.442695, %v117_v54  ;;  %v115_v58 = vmax.f32 %v111_v55, 0.0 }
 0x143   :  { %v114_v59 = vmax.f32 %v110_v56, 0.0 }
 0x144   :  { %204 = vpow2.f32 %v121_v57  ;;  %v119_v60 = vsub.f32 0.0, %v115_v58 }
 0x145   :  { %v118_v61 = vsub.f32 0.0, %v114_v59 }
 0x146   :  { %v125_v62 = vmul.f32 1.442695, %v119_v60 }
 0x147   :  { %v123_v63 = vmul.f32 1.442695, %v118_v61 }
 0x148   :  { %206 = vpow2.f32 %v125_v62 }
 0x149   :  { %208 = vpow2.f32 %v123_v63 }
 0x151   :  { %v205_v0 = vpop.eup %204 }
 0x152   :  { %v129_v1 = vsub.f32 1.0, %v205_v0 }
 0x154   :  { %v133_v5 = vmul.f32 %v129_v1, %v129_v1 }
 0x155   :  { %v207_v2 = vpop.eup %206 }
 0x156   :  { %v209_v3 = vpop.eup %208  ;;  %v131_v4 = vsub.f32 1.0, %v207_v2  ;;  %v137_v9 = vmul.f32 %v133_v5, %v113_v50 }
 0x157   :  { %v130_v6 = vsub.f32 1.0, %v209_v3 }
 0x158   :  { %v135_v8 = vmul.f32 %v131_v4, %v131_v4 }
 0x159   :  { %v134_v7 = vmul.f32 %v130_v6, %v130_v6 }
 0x15a   :  { %v139_v12 = vmul.f32 %v135_v8, %v115_v58 }
 0x15b   :  { %v138_v10 = vmul.f32 %v134_v7, %v114_v59 }
 0x15d   :  { %v161_v11 = vadd.f32 %v138_v10, %v137_v9 }
 0x15f   :  { %v162_v13 = vadd.f32 %v161_v11, %v139_v12 }
 0x161   :  { %v164_v14 = vrot.slane %v162_v13, 4 }
 0x163   :  { %v165_v15 = vadd.f32 %v164_v14, %v162_v13 }
 0x165   :  { %v166_v16 = vrot.slane %v165_v15, 2 }
 0x167   :  { %v167_v17 = vadd.f32 %v166_v16, %v165_v15 }
 0x169   :  { %v168_v18 = vrot.slane %v167_v17, 1 }
 0x16b   :  { %v169_v20 = vadd.f32 %v168_v18, %v167_v17 }
 0x16d   :  { %v170_v21 = vadd.f32 %v169_v20, %v160_v19 }
 0x16f   :  { %172 = vst.msk [vmem:[#allocation2] sm:$0x1] %vm16_vm4, %v170_v21 }
 0x170   :  { %221 = shalt.err (!%p218_p4)
}
 0x171   :  { %182 = dma.vmem_to_hbm [thread:$0]  %s180_s20, 16, %s284_s2, [#allocation3]  }
 0x172   :  { %230 = dma.done.wait [#allocation3], 16  }
 0x173   :  { %231 = vsyncadd [#allocation3], 4294967280 }
 0x174   :  { %186 = vsyncpa [#allocation3], 1 }

</bundles_post_ra>
